<compile_context>
chip_gen: v7x
topology: tpu7x:2x2x1
jax: 0.10.0
libtpu: 0.0.40
codegen_flags: <defaults>
</compile_context>

<pallas_src>
import numpy as np
import jax
import jax.numpy as jnp
from jax.experimental import pallas as pl
from jax.experimental.pallas import tpu as pltpu


def bilinear_matrix(n_in, n_out):
    """Interpolation matrix U (n_out, n_in) for 1D bilinear, align_corners=True."""
    U = np.zeros((n_out, n_in), dtype=np.float32)
    if n_in == 1:
        U[:, 0] = 1.0
        return U
    for i in range(n_out):
        src = i * (n_in - 1) / (n_out - 1)
        i0 = int(np.floor(src))
        i1 = min(i0 + 1, n_in - 1)
        w1 = src - i0
        U[i, i0] += 1.0 - w1
        U[i, i1] += w1
    return U


def upsample_conv_tap_matrices(H, W):
    """For each 3x3 tap (ky,kx): M_k (H*W, Ho*Wo) mapping the input image to the
    zero-padded, 2x bilinear-upsampled image shifted by (ky,kx).  Pad rows of the
    interpolation matrices are zero, so conv padding comes out of the matmul for
    free."""
    Ho, Wo = 2 * H, 2 * W
    Uh = bilinear_matrix(H, Ho)
    Uw = bilinear_matrix(W, Wo)
    Uh_pad = np.zeros((Ho + 2, H), np.float32)
    Uh_pad[1:Ho + 1] = Uh
    Uw_pad = np.zeros((Wo + 2, W), np.float32)
    Uw_pad[1:Wo + 1] = Uw
    mats = []
    for ky in range(3):
        A = Uh_pad[ky:ky + Ho, :]               # (Ho, H)
        for kx in range(3):
            B = Uw_pad[kx:kx + Wo, :]           # (Wo, W)
            # M[(h,w),(p,q)] = A[p,h] * B[q,w]
            M = np.einsum('ph,qw->hwpq', A, B).reshape(H * W, Ho * Wo)
            mats.append(M)
    return np.stack(mats, axis=0)               # (9, H*W, Ho*Wo)


def up_kernel(x1_ref, x2_ref, m_ref, w_ref, scale_ref, shift_ref, out_ref, g_ref):
    # x1_ref:    (1, Cin, H*W)       f32   input feature map (channel-major)
    # x2_ref:    (1, Cout, Ho*Wo)    f32   skip connection (already flattened)
    # m_ref:     (9, H*W, Ho*Wo)     bf16  fused pad+shift+bilinear-upsample mats
    # w_ref:     (Cout, 9*Cin)       bf16  conv weights, K = (ky,kx,cin)
    # scale_ref: (Cout, 1)           f32   fused BN scale  gamma / sqrt(var+eps)
    # shift_ref: (Cout, 1)           f32   fused BN shift  beta - mean*scale
    # out_ref:   (1, 2*Cout, Ho*Wo)  f32   [x2 ; BN(conv(upsample(relu(x1))))]
    # g_ref:     (9*Cin, Ho*Wo)      f32   VMEM scratch: im2col of the upsample
    cin = x1_ref.shape[1]
    cout = w_ref.shape[0]

    # ReLU on the VPU in f32, cast once to bf16 for the MXU.
    x = jnp.maximum(x1_ref[0], 0.0).astype(m_ref.dtype)          # (Cin, H*W)

    # Build im2col G: 9 taps, each one matmul (Cin, H*W) @ (H*W, Ho*Wo).
    # Pad + shift are inside m_ref, so there is no pad buffer and no strided
    # slice copies; writes land on 8-row (Cin) aligned sublane blocks.
    for kt in range(9):
        z = jnp.dot(x, m_ref[kt], preferred_element_type=jnp.float32)
        g_ref[kt * cin:(kt + 1) * cin, :] = z                    # (Cin, Ho*Wo)

    # Single channel/tap-mixing matmul: (Cout, 9*Cin) @ (9*Cin, Ho*Wo).
    conv = jnp.dot(w_ref[...], g_ref[...].astype(w_ref.dtype),
                   preferred_element_type=jnp.float32)           # (Cout, Ho*Wo)

    # Fused inference BatchNorm (per-channel affine) in f32 on the VPU.
    conv = conv * scale_ref[...] + shift_ref[...]

    # Fused concatenate: skip tensor in channels [0, Cout), conv in [Cout, 2Cout).
    out_ref[0, :cout, :] = x2_ref[0]
    out_ref[0, cout:, :] = conv.astype(out_ref.dtype)


def up_forward(x1_nchw, x2_nchw, w_hwio, scale, shift):
    """x1: (N, Cin, H, W), x2: (N, Cout, 2H, 2W) -> (N, 2*Cout, 2H, 2W)."""
    N, Cin, H, W = x1_nchw.shape
    Ho, Wo = 2 * H, 2 * W
    S = Ho * Wo
    Cout = w_hwio.shape[-1]
    assert x2_nchw.shape == (N, Cout, Ho, Wo)

    # Host-side constants (tiny).
    mt = jnp.asarray(upsample_conv_tap_matrices(H, W), dtype=jnp.bfloat16)
    wmat = jnp.transpose(jnp.reshape(w_hwio, (9 * Cin, Cout))).astype(jnp.bfloat16)
    scale2 = scale.reshape(Cout, 1).astype(jnp.float32)
    shift2 = shift.reshape(Cout, 1).astype(jnp.float32)

    # Free reshapes (trailing dims are contiguous); no NCHW<->NHWC transposes.
    x1_r = jnp.reshape(x1_nchw, (N, Cin, H * W))
    x2_r = jnp.reshape(x2_nchw, (N, Cout, S)).astype(jnp.float32)

    flops = N * (9 * 2 * Cin * (H * W) * S + 2 * Cout * (9 * Cin) * S)
    bytes_accessed = (x1_r.size * x1_r.dtype.itemsize + x2_r.size * 4
                      + mt.size * 2 + wmat.size * 2
                      + (scale2.size + shift2.size) * 4
                      + N * 2 * Cout * S * 4)

    out = pl.pallas_call(
        up_kernel,
        out_shape=jax.ShapeDtypeStruct((N, 2 * Cout, S), jnp.float32),
        grid_spec=pltpu.PrefetchScalarGridSpec(
            num_scalar_prefetch=0,
            grid=(N,),
            in_specs=[
                pl.BlockSpec((1, Cin, H * W), lambda n: (n, 0, 0)),
                pl.BlockSpec((1, Cout, S), lambda n: (n, 0, 0)),
                pl.BlockSpec((9, H * W, S), lambda n: (0, 0, 0)),
                pl.BlockSpec((Cout, 9 * Cin), lambda n: (0, 0)),
                pl.BlockSpec((Cout, 1), lambda n: (0, 0)),
                pl.BlockSpec((Cout, 1), lambda n: (0, 0)),
            ],
            out_specs=pl.BlockSpec((1, 2 * Cout, S), lambda n: (n, 0, 0)),
            scratch_shapes=[pltpu.VMEM((9 * Cin, S), jnp.float32)],
        ),
        compiler_params=pltpu.CompilerParams(
            dimension_semantics=("parallel",)),
        cost_estimate=pl.CostEstimate(
            flops=flops, transcendentals=0, bytes_accessed=bytes_accessed),
    )(x1_r, x2_r, mt, wmat, scale2, shift2)

    return jnp.reshape(out, (N, 2 * Cout, Ho, Wo))


def up_reference(x1_nchw, x2_nchw, w_hwio, scale, shift):
    """Pure-JAX f32 reference of the same forward pass (NCHW)."""
    N, Cin, H, W = x1_nchw.shape
    Uh = jnp.asarray(bilinear_matrix(H, 2 * H))
    Uw = jnp.asarray(bilinear_matrix(W, 2 * W))
    x = jnp.maximum(x1_nchw, 0.0)
    up = jnp.einsum('ph,nchw->ncpw', Uh, x)
    up = jnp.einsum('qw,ncpw->ncpq', Uw, up)
    w_oihw = jnp.transpose(w_hwio, (3, 2, 0, 1))
    conv = jax.lax.conv_general_dilated(
        up, w_oihw, window_strides=(1, 1), padding=((1, 1), (1, 1)),
        dimension_numbers=('NCHW', 'OIHW', 'NCHW'))
    conv = conv * scale[None, :, None, None] + shift[None, :, None, None]
    return jnp.concatenate([x2_nchw, conv], axis=1)


if __name__ == "__main__":
    # Up(in_channels=4, out_channels=4, inner=False) -> conv expects 2*4=8 channels
    N, in_channels, out_channels, H, W = 2, 4, 4, 8, 8
    Cin = 2 * in_channels           # inner=False doubles the conv input channels
    Cout = out_channels

    key = jax.random.PRNGKey(0)
    k1, k2, k3, k4, k5, k6, k7 = jax.random.split(key, 7)

    x1 = jax.random.normal(k1, (N, Cin, H, W), jnp.float32)
    x2 = jax.random.normal(k2, (N, Cout, 2 * H, 2 * W), jnp.float32)

    # Conv2d(Cin, Cout, 3, padding=1, bias=False) weight, stored HWIO
    w_hwio = jax.random.normal(k3, (3, 3, Cin, Cout), jnp.float32) / np.sqrt(9.0 * Cin)

    # BatchNorm2d(Cout) parameters (inference mode, deterministic init)
    gamma = 1.0 + 0.1 * jax.random.normal(k4, (Cout,), jnp.float32)
    beta = 0.1 * jax.random.normal(k5, (Cout,), jnp.float32)
    running_mean = 0.1 * jax.random.normal(k6, (Cout,), jnp.float32)
    running_var = jax.random.uniform(k7, (Cout,), jnp.float32, minval=0.5, maxval=1.5)
    eps = 1e-5
    scale = gamma / jnp.sqrt(running_var + eps)
    shift = beta - running_mean * scale

    out = up_forward(x1, x2, w_hwio, scale, shift)
    out = jax.block_until_ready(out)

    ref = up_reference(x1, x2, w_hwio, scale, shift)
    # bf16 MXU operands vs the f32 reference -> loosened tolerance (per review).
    np.testing.assert_allclose(np.asarray(out), np.asarray(ref), rtol=2e-2, atol=5e-2)
    assert out.shape == (N, 2 * Cout, 2 * H, 2 * W)
    print("KERNEL_OK")
</pallas_src>

<mosaic_0001>
module attributes {stable_mosaic.version = 11 : i64} {
  func.func @up_kernel(%arg0: i32, %arg1: memref<1x8x64xf32, #tpu.memory_space<vmem>>, %arg2: memref<1x4x256xf32, #tpu.memory_space<vmem>>, %arg3: memref<9x64x256xbf16, #tpu.memory_space<vmem>>, %arg4: memref<4x72xbf16, #tpu.memory_space<vmem>>, %arg5: memref<4x1xf32, #tpu.memory_space<vmem>>, %arg6: memref<4x1xf32, #tpu.memory_space<vmem>>, %arg7: memref<1x8x256xf32, #tpu.memory_space<vmem>>, %arg8: memref<72x256xf32, #tpu.memory_space<vmem>>) attributes {dimension_semantics = [#tpu.dimension_semantics<parallel>], iteration_bounds = array<i64: 2>, scalar_prefetch = 0 : i64, scratch_operands = 1 : i64, tpu.core_type = #tpu.core_type<tc>, window_params = [{transform_indices = @transform_0, window_bounds = array<i64: 1, 8, 64>}, {transform_indices = @transform_1, window_bounds = array<i64: 1, 4, 256>}, {pipeline_mode = #tpu.pipeline_mode<synchronous>, transform_indices = @transform_2, window_bounds = array<i64: 9, 64, 256>}, {pipeline_mode = #tpu.pipeline_mode<synchronous>, transform_indices = @transform_3, window_bounds = array<i64: 4, 72>}, {pipeline_mode = #tpu.pipeline_mode<synchronous>, transform_indices = @transform_4, window_bounds = array<i64: 4, 1>}, {pipeline_mode = #tpu.pipeline_mode<synchronous>, transform_indices = @transform_5, window_bounds = array<i64: 4, 1>}, {transform_indices = @transform_6, window_bounds = array<i64: 1, 8, 256>}]} {
    %c0 = arith.constant 0 : index
    %c0_0 = arith.constant 0 : index
    %c0_1 = arith.constant 0 : index
    %0 = vector.load %arg1[%c0, %c0_0, %c0_1] : memref<1x8x64xf32, #tpu.memory_space<vmem>>, vector<1x8x64xf32>
    %1 = vector.shape_cast %0 : vector<1x8x64xf32> to vector<8x64xf32>
    %cst = arith.constant 0.000000e+00 : f32
    %2 = vector.broadcast %cst : f32 to vector<8x64xf32>
    %3 = arith.maximumf %1, %2 : vector<8x64xf32>
    %4 = arith.truncf %3 : vector<8x64xf32> to vector<8x64xbf16>
    %c0_2 = arith.constant 0 : index
    %c0_3 = arith.constant 0 : index
    %c0_4 = arith.constant 0 : index
    %5 = vector.load %arg3[%c0_2, %c0_3, %c0_4] : memref<9x64x256xbf16, #tpu.memory_space<vmem>>, vector<1x64x256xbf16>
    %6 = vector.shape_cast %5 : vector<1x64x256xbf16> to vector<64x256xbf16>
    %cst_5 = arith.constant dense<0.000000e+00> : vector<8x256xf32>
    %7 = tpu.matmul %4, %6, %cst_5 {dimension_numbers = #tpu.dot_dimension_numbers<[1], [0], [0], [1], [0, 0, 1, 1], [], []>} : vector<8x64xbf16>, vector<64x256xbf16>, vector<8x256xf32> -> vector<8x256xf32>
    %c0_6 = arith.constant 0 : index
    %c0_7 = arith.constant 0 : index
    %8 = vector.load %arg8[%c0_6, %c0_7] : memref<72x256xf32, #tpu.memory_space<vmem>>, vector<8x256xf32>
    tpu.vector_store %arg8[%c0_6, %c0_7], %7 {strides = array<i32>} : memref<72x256xf32, #tpu.memory_space<vmem>>, vector<8x256xf32>,
    %c1 = arith.constant 1 : index
    %c0_8 = arith.constant 0 : index
    %c0_9 = arith.constant 0 : index
    %9 = vector.load %arg3[%c1, %c0_8, %c0_9] : memref<9x64x256xbf16, #tpu.memory_space<vmem>>, vector<1x64x256xbf16>
    %10 = vector.shape_cast %9 : vector<1x64x256xbf16> to vector<64x256xbf16>
    %cst_10 = arith.constant dense<0.000000e+00> : vector<8x256xf32>
    %11 = tpu.matmul %4, %10, %cst_10 {dimension_numbers = #tpu.dot_dimension_numbers<[1], [0], [0], [1], [0, 0, 1, 1], [], []>} : vector<8x64xbf16>, vector<64x256xbf16>, vector<8x256xf32> -> vector<8x256xf32>
    %c8 = arith.constant 8 : index
    %c0_11 = arith.constant 0 : index
    %12 = vector.load %arg8[%c8, %c0_11] : memref<72x256xf32, #tpu.memory_space<vmem>>, vector<8x256xf32>
    tpu.vector_store %arg8[%c8, %c0_11], %11 {strides = array<i32>} : memref<72x256xf32, #tpu.memory_space<vmem>>, vector<8x256xf32>,
    %c2 = arith.constant 2 : index
    %c0_12 = arith.constant 0 : index
    %c0_13 = arith.constant 0 : index
    %13 = vector.load %arg3[%c2, %c0_12, %c0_13] : memref<9x64x256xbf16, #tpu.memory_space<vmem>>, vector<1x64x256xbf16>
    %14 = vector.shape_cast %13 : vector<1x64x256xbf16> to vector<64x256xbf16>
    %cst_14 = arith.constant dense<0.000000e+00> : vector<8x256xf32>
    %15 = tpu.matmul %4, %14, %cst_14 {dimension_numbers = #tpu.dot_dimension_numbers<[1], [0], [0], [1], [0, 0, 1, 1], [], []>} : vector<8x64xbf16>, vector<64x256xbf16>, vector<8x256xf32> -> vector<8x256xf32>
    %c16 = arith.constant 16 : index
    %c0_15 = arith.constant 0 : index
    %16 = vector.load %arg8[%c16, %c0_15] : memref<72x256xf32, #tpu.memory_space<vmem>>, vector<8x256xf32>
    tpu.vector_store %arg8[%c16, %c0_15], %15 {strides = array<i32>} : memref<72x256xf32, #tpu.memory_space<vmem>>, vector<8x256xf32>,
    %c3 = arith.constant 3 : index
    %c0_16 = arith.constant 0 : index
    %c0_17 = arith.constant 0 : index
    %17 = vector.load %arg3[%c3, %c0_16, %c0_17] : memref<9x64x256xbf16, #tpu.memory_space<vmem>>, vector<1x64x256xbf16>
    %18 = vector.shape_cast %17 : vector<1x64x256xbf16> to vector<64x256xbf16>
    %cst_18 = arith.constant dense<0.000000e+00> : vector<8x256xf32>
    %19 = tpu.matmul %4, %18, %cst_18 {dimension_numbers = #tpu.dot_dimension_numbers<[1], [0], [0], [1], [0, 0, 1, 1], [], []>} : vector<8x64xbf16>, vector<64x256xbf16>, vector<8x256xf32> -> vector<8x256xf32>
    %c24 = arith.constant 24 : index
    %c0_19 = arith.constant 0 : index
    %20 = vector.load %arg8[%c24, %c0_19] : memref<72x256xf32, #tpu.memory_space<vmem>>, vector<8x256xf32>
    tpu.vector_store %arg8[%c24, %c0_19], %19 {strides = array<i32>} : memref<72x256xf32, #tpu.memory_space<vmem>>, vector<8x256xf32>,
    %c4 = arith.constant 4 : index
    %c0_20 = arith.constant 0 : index
    %c0_21 = arith.constant 0 : index
    %21 = vector.load %arg3[%c4, %c0_20, %c0_21] : memref<9x64x256xbf16, #tpu.memory_space<vmem>>, vector<1x64x256xbf16>
    %22 = vector.shape_cast %21 : vector<1x64x256xbf16> to vector<64x256xbf16>
    %cst_22 = arith.constant dense<0.000000e+00> : vector<8x256xf32>
    %23 = tpu.matmul %4, %22, %cst_22 {dimension_numbers = #tpu.dot_dimension_numbers<[1], [0], [0], [1], [0, 0, 1, 1], [], []>} : vector<8x64xbf16>, vector<64x256xbf16>, vector<8x256xf32> -> vector<8x256xf32>
    %c32 = arith.constant 32 : index
    %c0_23 = arith.constant 0 : index
    %24 = vector.load %arg8[%c32, %c0_23] : memref<72x256xf32, #tpu.memory_space<vmem>>, vector<8x256xf32>
    tpu.vector_store %arg8[%c32, %c0_23], %23 {strides = array<i32>} : memref<72x256xf32, #tpu.memory_space<vmem>>, vector<8x256xf32>,
    %c5 = arith.constant 5 : index
    %c0_24 = arith.constant 0 : index
    %c0_25 = arith.constant 0 : index
    %25 = vector.load %arg3[%c5, %c0_24, %c0_25] : memref<9x64x256xbf16, #tpu.memory_space<vmem>>, vector<1x64x256xbf16>
    %26 = vector.shape_cast %25 : vector<1x64x256xbf16> to vector<64x256xbf16>
    %cst_26 = arith.constant dense<0.000000e+00> : vector<8x256xf32>
    %27 = tpu.matmul %4, %26, %cst_26 {dimension_numbers = #tpu.dot_dimension_numbers<[1], [0], [0], [1], [0, 0, 1, 1], [], []>} : vector<8x64xbf16>, vector<64x256xbf16>, vector<8x256xf32> -> vector<8x256xf32>
    %c40 = arith.constant 40 : index
    %c0_27 = arith.constant 0 : index
    %28 = vector.load %arg8[%c40, %c0_27] : memref<72x256xf32, #tpu.memory_space<vmem>>, vector<8x256xf32>
    tpu.vector_store %arg8[%c40, %c0_27], %27 {strides = array<i32>} : memref<72x256xf32, #tpu.memory_space<vmem>>, vector<8x256xf32>,
    %c6 = arith.constant 6 : index
    %c0_28 = arith.constant 0 : index
    %c0_29 = arith.constant 0 : index
    %29 = vector.load %arg3[%c6, %c0_28, %c0_29] : memref<9x64x256xbf16, #tpu.memory_space<vmem>>, vector<1x64x256xbf16>
    %30 = vector.shape_cast %29 : vector<1x64x256xbf16> to vector<64x256xbf16>
    %cst_30 = arith.constant dense<0.000000e+00> : vector<8x256xf32>
    %31 = tpu.matmul %4, %30, %cst_30 {dimension_numbers = #tpu.dot_dimension_numbers<[1], [0], [0], [1], [0, 0, 1, 1], [], []>} : vector<8x64xbf16>, vector<64x256xbf16>, vector<8x256xf32> -> vector<8x256xf32>
    %c48 = arith.constant 48 : index
    %c0_31 = arith.constant 0 : index
    %32 = vector.load %arg8[%c48, %c0_31] : memref<72x256xf32, #tpu.memory_space<vmem>>, vector<8x256xf32>
    tpu.vector_store %arg8[%c48, %c0_31], %31 {strides = array<i32>} : memref<72x256xf32, #tpu.memory_space<vmem>>, vector<8x256xf32>,
    %c7 = arith.constant 7 : index
    %c0_32 = arith.constant 0 : index
    %c0_33 = arith.constant 0 : index
    %33 = vector.load %arg3[%c7, %c0_32, %c0_33] : memref<9x64x256xbf16, #tpu.memory_space<vmem>>, vector<1x64x256xbf16>
    %34 = vector.shape_cast %33 : vector<1x64x256xbf16> to vector<64x256xbf16>
    %cst_34 = arith.constant dense<0.000000e+00> : vector<8x256xf32>
    %35 = tpu.matmul %4, %34, %cst_34 {dimension_numbers = #tpu.dot_dimension_numbers<[1], [0], [0], [1], [0, 0, 1, 1], [], []>} : vector<8x64xbf16>, vector<64x256xbf16>, vector<8x256xf32> -> vector<8x256xf32>
    %c56 = arith.constant 56 : index
    %c0_35 = arith.constant 0 : index
    %36 = vector.load %arg8[%c56, %c0_35] : memref<72x256xf32, #tpu.memory_space<vmem>>, vector<8x256xf32>
    tpu.vector_store %arg8[%c56, %c0_35], %35 {strides = array<i32>} : memref<72x256xf32, #tpu.memory_space<vmem>>, vector<8x256xf32>,
    %c8_36 = arith.constant 8 : index
    %c0_37 = arith.constant 0 : index
    %c0_38 = arith.constant 0 : index
    %37 = vector.load %arg3[%c8_36, %c0_37, %c0_38] : memref<9x64x256xbf16, #tpu.memory_space<vmem>>, vector<1x64x256xbf16>
    %38 = vector.shape_cast %37 : vector<1x64x256xbf16> to vector<64x256xbf16>
    %cst_39 = arith.constant dense<0.000000e+00> : vector<8x256xf32>
    %39 = tpu.matmul %4, %38, %cst_39 {dimension_numbers = #tpu.dot_dimension_numbers<[1], [0], [0], [1], [0, 0, 1, 1], [], []>} : vector<8x64xbf16>, vector<64x256xbf16>, vector<8x256xf32> -> vector<8x256xf32>
    %c64 = arith.constant 64 : index
    %c0_40 = arith.constant 0 : index
    %40 = vector.load %arg8[%c64, %c0_40] : memref<72x256xf32, #tpu.memory_space<vmem>>, vector<8x256xf32>
    tpu.vector_store %arg8[%c64, %c0_40], %39 {strides = array<i32>} : memref<72x256xf32, #tpu.memory_space<vmem>>, vector<8x256xf32>,
    %c0_41 = arith.constant 0 : index
    %c0_42 = arith.constant 0 : index
    %41 = vector.load %arg4[%c0_41, %c0_42] : memref<4x72xbf16, #tpu.memory_space<vmem>>, vector<4x72xbf16>
    %c0_43 = arith.constant 0 : index
    %c0_44 = arith.constant 0 : index
    %42 = vector.load %arg8[%c0_43, %c0_44] : memref<72x256xf32, #tpu.memory_space<vmem>>, vector<72x256xf32>
    %43 = arith.truncf %42 : vector<72x256xf32> to vector<72x256xbf16>
    %cst_45 = arith.constant dense<0.000000e+00> : vector<4x256xf32>
    %44 = tpu.matmul %41, %43, %cst_45 {dimension_numbers = #tpu.dot_dimension_numbers<[1], [0], [0], [1], [0, 0, 1, 1], [], []>} : vector<4x72xbf16>, vector<72x256xbf16>, vector<4x256xf32> -> vector<4x256xf32>
    %c0_46 = arith.constant 0 : index
    %c0_47 = arith.constant 0 : index
    %45 = vector.load %arg5[%c0_46, %c0_47] : memref<4x1xf32, #tpu.memory_space<vmem>>, vector<4x1xf32>
    %46 = vector.broadcast %45 : vector<4x1xf32> to vector<4x256xf32>
    %47 = arith.mulf %44, %46 : vector<4x256xf32>
    %c0_48 = arith.constant 0 : index
    %c0_49 = arith.constant 0 : index
    %48 = vector.load %arg6[%c0_48, %c0_49] : memref<4x1xf32, #tpu.memory_space<vmem>>, vector<4x1xf32>
    %49 = vector.broadcast %48 : vector<4x1xf32> to vector<4x256xf32>
    %50 = arith.addf %47, %49 : vector<4x256xf32>
    %c0_50 = arith.constant 0 : index
    %c0_51 = arith.constant 0 : index
    %c0_52 = arith.constant 0 : index
    %51 = vector.load %arg2[%c0_50, %c0_51, %c0_52] : memref<1x4x256xf32, #tpu.memory_space<vmem>>, vector<1x4x256xf32>
    %52 = vector.shape_cast %51 : vector<1x4x256xf32> to vector<4x256xf32>
    %c0_53 = arith.constant 0 : index
    %c0_54 = arith.constant 0 : index
    %c0_55 = arith.constant 0 : index
    %53 = vector.load %arg7[%c0_53, %c0_54, %c0_55] : memref<1x8x256xf32, #tpu.memory_space<vmem>>, vector<1x4x256xf32>
    %54 = vector.shape_cast %53 : vector<1x4x256xf32> to vector<4x256xf32>
    %55 = vector.shape_cast %52 : vector<4x256xf32> to vector<1x4x256xf32>
    tpu.vector_store %arg7[%c0_53, %c0_54, %c0_55], %55 {strides = array<i32>} : memref<1x8x256xf32, #tpu.memory_space<vmem>>, vector<1x4x256xf32>,
    %c0_56 = arith.constant 0 : index
    %c4_57 = arith.constant 4 : index
    %c0_58 = arith.constant 0 : index
    %56 = vector.load %arg7[%c0_56, %c4_57, %c0_58] : memref<1x8x256xf32, #tpu.memory_space<vmem>>, vector<1x4x256xf32>
    %57 = vector.shape_cast %56 : vector<1x4x256xf32> to vector<4x256xf32>
    %58 = vector.shape_cast %50 : vector<4x256xf32> to vector<1x4x256xf32>
    tpu.vector_store %arg7[%c0_56, %c4_57, %c0_58], %58 {strides = array<i32>} : memref<1x8x256xf32, #tpu.memory_space<vmem>>, vector<1x4x256xf32>,
    return
  }
  func.func @transform_0(%arg0: i32) -> (i32, i32, i32) {
    %c0_i32 = arith.constant 0 : i32
    %c0_i32_0 = arith.constant 0 : i32
    %c0_i32_1 = arith.constant 0 : i32
    return %arg0, %c0_i32, %c0_i32_0 : i32, i32, i32
  }
  func.func @transform_1(%arg0: i32) -> (i32, i32, i32) {
    %c0_i32 = arith.constant 0 : i32
    %c0_i32_0 = arith.constant 0 : i32
    %c0_i32_1 = arith.constant 0 : i32
    return %arg0, %c0_i32, %c0_i32_0 : i32, i32, i32
  }
  func.func @transform_2(%arg0: i32) -> (i32, i32, i32) {
    %c0_i32 = arith.constant 0 : i32
    %c0_i32_0 = arith.constant 0 : i32
    %c0_i32_1 = arith.constant 0 : i32
    %c0_i32_2 = arith.constant 0 : i32
    return %c0_i32, %c0_i32_0, %c0_i32_1 : i32, i32, i32
  }
  func.func @transform_3(%arg0: i32) -> (i32, i32) {
    %c0_i32 = arith.constant 0 : i32
    %c0_i32_0 = arith.constant 0 : i32
    %c0_i32_1 = arith.constant 0 : i32
    return %c0_i32, %c0_i32_0 : i32, i32
  }
  func.func @transform_4(%arg0: i32) -> (i32, i32) {
    %c0_i32 = arith.constant 0 : i32
    %c0_i32_0 = arith.constant 0 : i32
    %c0_i32_1 = arith.constant 0 : i32
    return %c0_i32, %c0_i32_0 : i32, i32
  }
  func.func @transform_5(%arg0: i32) -> (i32, i32) {
    %c0_i32 = arith.constant 0 : i32
    %c0_i32_0 = arith.constant 0 : i32
    %c0_i32_1 = arith.constant 0 : i32
    return %c0_i32, %c0_i32_0 : i32, i32
  }
  func.func @transform_6(%arg0: i32) -> (i32, i32, i32) {
    %c0_i32 = arith.constant 0 : i32
    %c0_i32_0 = arith.constant 0 : i32
    %c0_i32_1 = arith.constant 0 : i32
    return %arg0, %c0_i32, %c0_i32_0 : i32, i32, i32
  }
}

</mosaic_0001>

<bundles_post_ra>
// kernel: tpu_custom_call.1
= control target key start
LH: loop header
LB: loop body
LE: loop exit
PB: predicated region body
PF: predicated region fallthrough
CT: control target
= control target key end

     0   :  { %s2144_s0 = inlined_call_operand.hbm [shape: f32[2,8,64], index: 0, kind: input, shape index: {}]   ;;  %s2145_s1 = inlined_call_operand.hbm [shape: f32[2,4,256], index: 1, kind: input, shape index: {}]   ;;  %s2146_s2 = inlined_call_operand.hbm [shape: bf16[9,64,256], index: 2, kind: input, shape index: {}]   ;;  %s2147_s3 = inlined_call_operand.vmem [shape: bf16[4,72], index: 3, kind: input, shape index: {}]   ;;  %s2148_s4 = inlined_call_operand.vmem [shape: f32[4,1], index: 4, kind: input, shape index: {}]   ;;  %s2149_s5 = inlined_call_operand.vmem [shape: f32[4,1], index: 5, kind: input, shape index: {}]   ;;  %s2150_s6 = inlined_call_operand.hbm [shape: f32[2,8,256], index: 6, kind: output, shape index: {}]  }
   0x1   :  { %2156 = sst [smem:[#allocation16_spill]] %s2146_s2 }
   0x2   :  { %11 = vsyncpa [#allocation4], 0 }
   0x3   :  { %13 = vsyncpa [#allocation4 + $0x1], 0 }
   0x4   :  { %14 = vsyncpa [#allocation7], 0 }
   0x5   :  { %16 = vsyncpa [#allocation7 + $0x1], 0 }
   0x6   :  { %17 = vsyncpa [#allocation5], 0 }
   0x7   :  { %19 = vsyncpa [#allocation5 + $0x1], 0  ;;  %s1867_s21 = smov 0   ;;  %s1869_s22 = smov 0  }
   0x8   :  { %s1871_s23 = smov 0   ;;  %s1873_s24 = smov 0  }
   0x9 LB: > { %2157 = sst [smem:[#allocation14_spill]] %s1819_s23  ;;  %s1888_s25 = sadd.s32 4294967295, %s1823_s24   ;;  %s1823_s24 = sphi %s1873_s24, %s2178_s24   ;;  %s1819_s23 = sphi %s1871_s23, %s2175_s23   ;;  %s1815_s22 = sphi %s1869_s22, %s2177_s22   ;;  %s1811_s21 = sphi %s1867_s21, %s2176_s21  }
   0xa   : > { %s1382_s26 = sadd.s32 4294967294, %s1823_s24   ;;  %p45_p0 = scmp.ne.s32.totalorder %s1815_s22, %s1811_s21 }
   0xb   : > { %p2151_p1 = scmp.eq.s32.totalorder %s1888_s25, 0  ;;  %p185_p3 = scmp.eq.s32.totalorder %s1382_s26, 1 }
   0xc   : > { %p1383_p5 = scmp.ge.s32.totalorder %s1823_s24, 1  ;;  %p192_p7 = scmp.lt.s32.totalorder %s1823_s24, 3 }
   0xd   : > { %p1897_p4 = por %p2151_p1, %p45_p0  ;;  %p1902_p6 = por %p185_p3, %p45_p0 }
   0xe   : > { %p1907_p8 = pnand %p1383_p5, %p192_p7  ;;  %s1825_s30 = smov [#allocation8]  }
   0xf   : > { %s2158_s27 = scalar_select %p1897_p4, 1, 0 }
  0x10   : > { %s2159_s28 = scalar_select %p1902_p6, 1, 0 }
  0x11   : > { %s2160_s29 = scalar_select %p1907_p8, 1, 0 }
  0x12   : > { %s204_s7 = sshll.u32 %s1825_s30, 4  ;;  %p1496_p9 = pneg %p1907_p8  ;;  %s1911_s7 = int_to_ptr.vmem [resolvable:$true] %s204_s7 }
  0x13   : > { %s1923_s9 = sadd.s32 1, %s1823_s24   ;;  %s32_s10 = sadd.s32 1, %s1819_s23 }
  0x14   : > { %p1918_p11 = pnand %p1496_p9, %p2151_p1  ;;  %s29_s11 = ssub.s32 %s1823_s24, %s1923_s9 }
  0x15   : > { %s2162_s2 = sld [smem:[#allocation16_spill]] }
  0x16   : > { %p1663_p13 = pneg %p1918_p11 }
  0x1b   : > { %s1661_s14 = scalar_lea.hbm %s2162_s2, 9216 }
  0x1c   : > { %p1662_p12 = scmp.ne.s32.totalorder %s2162_s2, %s1661_s14  ;;  %p1668_p5 = scmp.lt.u32.totalorder %s1661_s14, %s2162_s2 }
  0x1e   : > { %p1664_p0 = pnand %p1663_p13, %p1662_p12 }
  0x20   : > { %p1665_p3 = pneg %p1664_p0 }
  0x22   : > { %p1670_p7 = pnand %p1668_p5, %p1665_p3 }
  0x24   : > { %1673 = shalt.err (!%p1670_p7)
}
  0x25   : > { %s1674_s19 = scalar_lea.vmem %s1911_s7, 9216  ;;  %p1682_p2 = scmp.lt.s32.totalorder %s1911_s7, %s1911_s7 }
  0x26   : > { %p1675_p9 = scmp.ne.s32.totalorder %s1911_s7, %s1674_s19  ;;  %p1683_p6 = scmp.lt.s32.totalorder %s1674_s19, %s1674_s19 }
  0x28   : > { %p1677_p10 = pnand %p1675_p9, %p1663_p13  ;;  %p1684_p4 = por %p1683_p6, %p1682_p2 }
  0x2a   : > { %p1678_p1 = pneg %p1677_p10 }
  0x2c   : > { %p1685_p8 = pnand %p1684_p4, %p1678_p1 }
  0x2e   : > { %1688 = shalt.err (!%p1685_p8)
}
  0x2f   : > { %s1826_s20 = smov 128   ;;  %s1827_s26 = smov 8  }
  0x30   : > { %1499 = dma.hbm_to_vmem [thread:$0]  (!%p1918_p11), %s2162_s2, 9216, %s1911_s7, [#allocation7], %s1826_s20, %s1826_s20, %s1827_s26  }
  0x31   : > { %p30_p2 = scmp.eq.s32.totalorder %s29_s11, 0  ;;  %p39_p1 = scmp.ne.s32.totalorder %s1819_s23, %s1815_s22 }
  0x32   : > { %p40_p4 = scmp.eq.s32.totalorder %s1823_s24, 0  ;;  %p1512_p6 = scmp.lt.s32.totalorder %s1823_s24, 2 }
  0x33   : > { %s1954_s13 = scalar_select %p30_p2, %s1819_s23, %s32_s10  }
  0x34   : > { %p41_p8 = por %p40_p4, %p39_p1  ;;  %p2164_p10 = scmp.eq.s32.totalorder %s1888_s25, 1 }
  0x35   : > { %2163 = sst [smem:[#allocation15_spill]] %s1954_s13  ;;  %s227_s15 = sand.u32 1, %s1819_s23  }
  0x36   : > { %p1958_p12 = por %p2164_p10, %p39_p1  ;;  %s1387_s16 = sshll.u32 %s1823_s24, 7 }
  0x37   : > { %s1964_s17 = sshll.u32 %s227_s15, 3  ;;  %s1969_s7 = scalar_lea.hbm %s2144_s0, %s1387_s16 }
  0x38   : > { %s2165_s14 = scalar_select %p1958_p12, 1, 0 }
  0x39   : > { %s231_s10 = scalar_lea.vmem [#allocation3], %s1964_s17  ;;  %p1972_p11 = pnand %p1512_p6, %p41_p8 }
  0x3a   : > { %s238_s11 = sshll.u32 %s231_s10, 4  ;;  %s1981_s30 = scalar_lea.hbm %s2145_s1, %s1387_s16  ;;  %s1976_s11 = int_to_ptr.vmem [resolvable:$true] %s238_s11 }
  0x3b   : > { %s228_s12 = scalar_lea.sflag [#allocation4], %s227_s15  ;;  %s1689_s8 = scalar_lea.hbm %s1969_s7, 128 }
  0x3c   : > { %p1690_p13 = scmp.ne.s32.totalorder %s1969_s7, %s1689_s8  ;;  %p1691_p0 = pneg %p1972_p11 }
  0x3d   : > { %s1694_s2 = scalar_lea.hbm %s2144_s0, 256  ;;  %p1695_p7 = scmp.lt.u32.totalorder %s1969_s7, %s2144_s0 }
  0x3e   : > { %p1692_p3 = pnand %p1691_p0, %p1690_p13  ;;  %p1696_p9 = scmp.lt.u32.totalorder %s1694_s2, %s1689_s8 }
  0x3f   : > { %p1698_p1 = scmp.lt.u32.totalorder %s1689_s8, %s1969_s7 }
  0x40   : > { %p1693_p5 = pneg %p1692_p3  ;;  %p1697_p2 = por %p1696_p9, %p1695_p7 }
  0x42   : > { %p1699_p4 = por %p1698_p1, %p1697_p2 }
  0x44   : > { %p1700_p6 = pnand %p1699_p4, %p1693_p5 }
  0x46   : > { %1703 = shalt.err (!%p1700_p6)
}
  0x47   : > { %s1704_s15 = scalar_lea.vmem %s1976_s11, 128  ;;  %s1828_s16 = smov [#allocation3]  }
  0x48   : > { %p1705_p8 = scmp.ne.s32.totalorder %s1976_s11, %s1704_s15  ;;  %s1709_s20 = sshll.u32 %s1828_s16, 4  ;;  %s1710_s20 = int_to_ptr.vmem [resolvable:$false] %s1709_s20 }
  0x49   : > { %s1711_s23 = scalar_lea.vmem %s1710_s20, 256  ;;  %p1712_p3 = scmp.lt.s32.totalorder %s1976_s11, %s1710_s20 }
  0x4a   : > { %p1707_p10 = pnand %p1705_p8, %p1691_p0  ;;  %p1713_p7 = scmp.lt.s32.totalorder %s1711_s23, %s1704_s15 }
  0x4c   : > { %p1708_p13 = pneg %p1707_p10  ;;  %p1714_p9 = por %p1713_p7, %p1712_p3 }
  0x4e   : > { %p1715_p2 = pnand %p1714_p9, %p1708_p13 }
  0x50   : > { %1718 = shalt.err (!%p1715_p2)
}
  0x51   : > { %1503 = dma.hbm_to_vmem [thread:$0]  (!%p1972_p11), %s1969_s7, 128, %s1976_s11, %s228_s12  }
  0x52   : > { %s245_s2 = sand.u32 1, %s1823_s24   ;;  %s249_s13 = scalar_lea.vmem [#allocation6], %s1964_s17 }
  0x53   : > { %s257_s26 = sshll.u32 %s249_s13, 4  ;;  %s246_s8 = scalar_lea.sflag [#allocation7], %s245_s2  ;;  %s258_s26 = int_to_ptr.vmem [resolvable:$true] %s257_s26 }
  0x54   : > { %s1719_s18 = scalar_lea.hbm %s1981_s30, 128  ;;  %s1724_s16 = scalar_lea.hbm %s2145_s1, 256 }
  0x55   : > { %p1720_p5 = scmp.ne.s32.totalorder %s1981_s30, %s1719_s18  ;;  %p1725_p6 = scmp.lt.u32.totalorder %s1981_s30, %s2145_s1 }
  0x56   : > { %p1726_p8 = scmp.lt.u32.totalorder %s1724_s16, %s1719_s18  ;;  %p1728_p13 = scmp.lt.u32.totalorder %s1719_s18, %s1981_s30 }
  0x57   : > { %p1722_p1 = pnand %p1720_p5, %p1691_p0 }
  0x58   : > { %p1727_p10 = por %p1726_p8, %p1725_p6 }
  0x59   : > { %p1723_p4 = pneg %p1722_p1 }
  0x5a   : > { %p1729_p3 = por %p1728_p13, %p1727_p10 }
  0x5c   : > { %p1730_p7 = pnand %p1729_p3, %p1723_p4 }
  0x5e   : > { %1733 = shalt.err (!%p1730_p7)
}
  0x5f   : > { %s1734_s17 = scalar_lea.vmem %s258_s26, 128  ;;  %s1829_s7 = smov [#allocation6]  }
  0x60   : > { %p1735_p9 = scmp.ne.s32.totalorder %s258_s26, %s1734_s17  ;;  %s1739_s11 = sshll.u32 %s1829_s7, 4  ;;  %s1740_s11 = int_to_ptr.vmem [resolvable:$false] %s1739_s11 }
  0x61   : > { %s1741_s12 = scalar_lea.vmem %s1740_s11, 256  ;;  %p1742_p1 = scmp.lt.s32.totalorder %s258_s26, %s1740_s11 }
  0x62   : > { %p1737_p2 = pnand %p1735_p9, %p1691_p0  ;;  %p1743_p12 = scmp.lt.s32.totalorder %s1741_s12, %s1734_s17 }
  0x64   : > { %p1738_p5 = pneg %p1737_p2  ;;  %p1744_p6 = por %p1743_p12, %p1742_p1 }
  0x66   : > { %p1745_p8 = pnand %p1744_p6, %p1738_p5 }
  0x68   : > { %1748 = shalt.err (!%p1745_p8)
}
  0x69   : > { %1506 = dma.hbm_to_vmem [thread:$0]  (!%p1972_p11), %s1981_s30, 128, %s258_s26, %s246_s8  }
  0x6a   : > { %p2167_p4 = scmp.ne.s32.totalorder %s2160_s29, 0 }
  0x6b   : > { %s2032_s2 = sand.u32 (!%p2167_p4), 1, %s1815_s22   ;;  %p2168_p12 = scmp.ne.s32.totalorder (!%p2167_p4), %s2158_s27, 0 }
  0x6c   : > { %266 = sbr.rel (%p2167_p4) target bundleno = 656 (0x290), region = 44  ;;  %s1392_s13 = sshll.u32 (!%p2167_p4), %s2032_s2, 3 }
  0x6d   : > { %s269_s18 = scalar_lea.sflag (!%p2167_p4), [#allocation4], %s2032_s2  ;;  %s2036_s10 = scalar_lea.vmem (!%p2167_p4), [#allocation3], %s1392_s13 }
  0x73   : > { %1794 = dma.done.wait (%p2168_p12), %s269_s18, 128  }
  0x74   : > { %1796 = vsyncadd (%p2168_p12), %s269_s18, 4294967168  ;;  %s277_s19 = sand.u32 1, %s1888_s25   ;;  %s2043_s30 = scalar_lea.vmem [#allocation6], %s1392_s13 }
  0x75   : > { %s278_s29 = scalar_lea.sflag [#allocation7], %s277_s19 }
  0x76   : > { %1798 = dma.done.wait (%p2168_p12), %s278_s29, 128  }
  0x77   : > { %1800 = vsyncadd (%p2168_p12), %s278_s29, 4294967168  ;;  %p2169_p11 = scmp.eq.s32.totalorder %s1888_s25, 0 }
  0x79   : > { %1802 = dma.done.wait (%p2169_p11), [#allocation7], 9216   ;;  %p2170_p0 = pmov %p2169_p11 }
  0x7a   : > { %v1830_v0 = vmov 0   ;;  %v1552_v1 = vld [vmem:[#allocation8 + $0x4] ss:$8 sps:$4 sm:$0xff]   ;;  %v1556_v3 = vld [vmem:[#allocation8] ss:$8 sps:$4 sm:$0xff]   ;;  %vm371_vm0 = vcmask 523264  }
  0x7b   : > { %1804 = vsyncadd (%p2170_p0), [#allocation7], 4294958080  ;;  %407 = vmatprep.mubr.bf16.mxu0 %v1830_v0  ;;  %499 = vmatprep.mubr.bf16.mxu1 %v1830_v0  ;;  %v1554_v2 = vld [vmem:[#allocation8 + $0x44] ss:$8 sps:$4 sm:$0xff]   ;;  %v1557_v4 = vld [vmem:[#allocation8 + $0x40] ss:$8 sps:$4 sm:$0xff]  }
  0x7c   : > { %1551 = vset.pattern.permute.xlu0 %v1830_v0  ;;  %375 = vmatprep.subr.bf16.mxu0 %v1552_v1  ;;  %v1558_v5 = vld [vmem:[#allocation8 + $0x14] ss:$8 sps:$4 sm:$0xff]   ;;  %v1562_v7 = vld [vmem:[#allocation8 + $0x10] ss:$8 sps:$4 sm:$0xff]   ;;  %v1564_v9 = vld [vmem:[#allocation8 + $0x24] ss:$8 sps:$4 sm:$0xff]  }
  0x7d   : > { %467 = vmatprep.subr.bf16.mxu1 %v1554_v2  ;;  %376 = vmatpush1.bf16.msra.mxu0 %v1556_v3  ;;  %v1560_v6 = vld [vmem:[#allocation8 + $0x54] ss:$8 sps:$4 sm:$0xff]   ;;  %v1563_v8 = vld [vmem:[#allocation8 + $0x50] ss:$8 sps:$4 sm:$0xff]   ;;  %v1566_v10 = vld [vmem:[#allocation8 + $0x64] ss:$8 sps:$4 sm:$0xff]  }
  0x7e   : > { %468 = vmatpush1.bf16.msra.mxu1 %v1557_v4  ;;  %377 = vmatprep.subr.bf16.mxu0 %v1558_v5  ;;  %v1568_v11 = vld [vmem:[#allocation8 + $0x20] ss:$8 sps:$4 sm:$0xff]   ;;  %v1570_v13 = vld [vmem:[#allocation8 + $0x34] ss:$8 sps:$4 sm:$0xff]   ;;  %v1574_v16 = vld [vmem:[#allocation8 + $0x30] ss:$8 sps:$4 sm:$0xff]  }
  0x7f   : > { %469 = vmatprep.subr.bf16.mxu1 %v1560_v6  ;;  %v1569_v12 = vld [vmem:[#allocation8 + $0x60] ss:$8 sps:$4 sm:$0xff]   ;;  %v1572_v14 = vld [vmem:[#allocation8 + $0x74] ss:$8 sps:$4 sm:$0xff]   ;;  %v1575_v18 = vld [vmem:[#allocation8 + $0x70] ss:$8 sps:$4 sm:$0xff]  }
  0x80   : > { %v320_v15 = vld [vmem:[%s2036_s10] sm:$0xff]  ;;  %v1584_v24 = vld [vmem:[#allocation8 + $0x94] ss:$8 sps:$4 sm:$0xff]   ;;  %v1582_v26 = vld [vmem:[#allocation8 + $0x90] ss:$8 sps:$4 sm:$0xff]   ;;  %vm1187_vm1 = vcmask 1043456  }
  0x81   : > { %378 = vmatpush1.bf16.msra.mxu0 %v1562_v7  ;;  %v321_v17 = vmax.f32 %v320_v15, 0.0  ;;  %v1578_v19 = vld [vmem:[#allocation8 + $0x84] ss:$8 sps:$4 sm:$0xff]   ;;  %v1576_v22 = vld [vmem:[#allocation8 + $0x80] ss:$8 sps:$4 sm:$0xff]   ;;  %vm1183_vm2 = vcmask 588800  }
  0x82   : > { %470 = vmatpush1.bf16.msra.mxu1 %v1563_v8  ;;  %379 = vmatprep.subr.bf16.mxu0 %v1564_v9  ;;  %v1581_v20 = vld [vmem:[#allocation8 + $0xc4] ss:$8 sps:$4 sm:$0xff]   ;;  %v1579_v23 = vld [vmem:[#allocation8 + $0xc0] ss:$8 sps:$4 sm:$0xff]   ;;  %v1587_v25 = vld [vmem:[#allocation8 + $0xd4] ss:$8 sps:$4 sm:$0xff]  }
  0x83   : > { %471 = vmatprep.subr.bf16.mxu1 %v1566_v10  ;;  %v2057_v21 = vpack.c.bf16 %v321_v17, %v321_v17  ;;  %v1585_v27 = vld [vmem:[#allocation8 + $0xd0] ss:$8 sps:$4 sm:$0xff]   ;;  %v1590_v28 = vld [vmem:[#allocation8 + $0xa4] ss:$8 sps:$4 sm:$0xff]   ;;  %v1588_v30 = vld [vmem:[#allocation8 + $0xa0] ss:$8 sps:$4 sm:$0xff]  }
  0x84   : > { %v1593_v29 = vld [vmem:[#allocation8 + $0xe4] ss:$8 sps:$4 sm:$0xff]   ;;  %v1591_v31 = vld [vmem:[#allocation8 + $0xe0] ss:$8 sps:$4 sm:$0xff]   ;;  %v1596_v32 = vld [vmem:[#allocation8 + $0xb4] ss:$8 sps:$4 sm:$0xff]  }
  0x85   : > { %380 = vmatpush1.bf16.msra.mxu0 %v1568_v11  ;;  %v1599_v33 = vld [vmem:[#allocation8 + $0xf4] ss:$8 sps:$4 sm:$0xff]   ;;  %v1594_v34 = vld [vmem:[#allocation8 + $0xb0] ss:$8 sps:$4 sm:$0xff]   ;;  %v1602_v36 = vld [vmem:[#allocation8 + $0x104] ss:$8 sps:$4 sm:$0xff]  }
  0x86   : > { %472 = vmatpush1.bf16.msra.mxu1 %v1569_v12  ;;  %381 = vmatprep.subr.bf16.mxu0 %v1570_v13  ;;  %v1597_v35 = vld [vmem:[#allocation8 + $0xf0] ss:$8 sps:$4 sm:$0xff]   ;;  %v1605_v37 = vld [vmem:[#allocation8 + $0x144] ss:$8 sps:$4 sm:$0xff]   ;;  %v1600_v38 = vld [vmem:[#allocation8 + $0x100] ss:$8 sps:$4 sm:$0xff]  }
  0x87   : > { %473 = vmatprep.subr.bf16.mxu1 %v1572_v14  ;;  %v1603_v39 = vld [vmem:[#allocation8 + $0x140] ss:$8 sps:$4 sm:$0xff]   ;;  %v1608_v40 = vld [vmem:[#allocation8 + $0x114] ss:$8 sps:$4 sm:$0xff]   ;;  %v1606_v42 = vld [vmem:[#allocation8 + $0x110] ss:$8 sps:$4 sm:$0xff]  }
  0x88   : > { %v1611_v41 = vld [vmem:[#allocation8 + $0x154] ss:$8 sps:$4 sm:$0xff]   ;;  %v1609_v43 = vld [vmem:[#allocation8 + $0x150] ss:$8 sps:$4 sm:$0xff]   ;;  %v1614_v44 = vld [vmem:[#allocation8 + $0x124] ss:$8 sps:$4 sm:$0xff]  }
  0x89   : > { %382 = vmatpush1.bf16.msra.mxu0 %v1574_v16  ;;  %v1617_v45 = vld [vmem:[#allocation8 + $0x164] ss:$8 sps:$4 sm:$0xff]   ;;  %v1612_v46 = vld [vmem:[#allocation8 + $0x120] ss:$8 sps:$4 sm:$0xff]   ;;  %v1620_v48 = vld [vmem:[#allocation8 + $0x134] ss:$8 sps:$4 sm:$0xff]  }
  0x8a   : > { %474 = vmatpush1.bf16.msra.mxu1 %v1575_v18  ;;  %559 = vmatprep.subr.bf16.mxu0 %v1578_v19  ;;  %v1615_v47 = vld [vmem:[#allocation8 + $0x160] ss:$8 sps:$4 sm:$0xff]   ;;  %v1623_v49 = vld [vmem:[#allocation8 + $0x174] ss:$8 sps:$4 sm:$0xff]   ;;  %v1618_v50 = vld [vmem:[#allocation8 + $0x130] ss:$8 sps:$4 sm:$0xff]  }
  0x8b   : > { %651 = vmatprep.subr.bf16.mxu1 %v1581_v20  ;;  %v1621_v51 = vld [vmem:[#allocation8 + $0x170] ss:$8 sps:$4 sm:$0xff]   ;;  %v1626_v52 = vld [vmem:[#allocation8 + $0x184] ss:$8 sps:$4 sm:$0xff]   ;;  %v1624_v54 = vld [vmem:[#allocation8 + $0x180] ss:$8 sps:$4 sm:$0xff]  }
  0x8c   : > { %1404 = vmatmul.mubr.msk.bf16.vlgmr.msra.gmra.mrb[0].mxu0 %vm371_vm0, %v2057_v21  ;;  %v1629_v53 = vld [vmem:[#allocation8 + $0x1c4] ss:$8 sps:$4 sm:$0xff]   ;;  %v1627_v55 = vld [vmem:[#allocation8 + $0x1c0] ss:$8 sps:$4 sm:$0xff]   ;;  %v1632_v56 = vld [vmem:[#allocation8 + $0x194] ss:$8 sps:$4 sm:$0xff]  }
  0x8d   : > { %1413 = vmatmul.mubr.msk.bf16.vlgmr.msra.gmra.mrb[0].mxu1 %vm371_vm0, %v2057_v21  ;;  %560 = vmatpush1.bf16.msra.mxu0 %v1576_v22  ;;  %v1635_v57 = vld [vmem:[#allocation8 + $0x1d4] ss:$8 sps:$4 sm:$0xff]   ;;  %v1630_v58 = vld [vmem:[#allocation8 + $0x190] ss:$8 sps:$4 sm:$0xff]   ;;  %v1638_v60 = vld [vmem:[#allocation8 + $0x1a4] ss:$8 sps:$4 sm:$0xff]  }
  0x8e   : > { %652 = vmatpush1.bf16.msra.mxu1 %v1579_v23  ;;  %561 = vmatprep.subr.bf16.mxu0 %v1584_v24  ;;  %v1633_v59 = vld [vmem:[#allocation8 + $0x1d0] ss:$8 sps:$4 sm:$0xff]   ;;  %v1641_v61 = vld [vmem:[#allocation8 + $0x1e4] ss:$8 sps:$4 sm:$0xff]   ;;  %v1636_v62 = vld [vmem:[#allocation8 + $0x1a0] ss:$8 sps:$4 sm:$0xff]  }
  0x8f   : > { %653 = vmatprep.subr.bf16.mxu1 %v1587_v25  ;;  %591 = vmatprep.mubr.bf16.mxu0 %v1830_v0  ;;  %v1639_v63 = vld [vmem:[#allocation8 + $0x1e0] ss:$8 sps:$4 sm:$0xff]   ;;  %v1644_v1 = vld [vmem:[#allocation8 + $0x1b4] ss:$8 sps:$4 sm:$0xff]   ;;  %v1642_v3 = vld [vmem:[#allocation8 + $0x1b0] ss:$8 sps:$4 sm:$0xff]  }
  0x90   : > { %683 = vmatprep.mubr.bf16.mxu1 %v1830_v0  ;;  %v1647_v2 = vld [vmem:[#allocation8 + $0x1f4] ss:$8 sps:$4 sm:$0xff]   ;;  %v1645_v4 = vld [vmem:[#allocation8 + $0x1f0] ss:$8 sps:$4 sm:$0xff]   ;;  %v1650_v5 = vld [vmem:[#allocation8 + $0x204] ss:$8 sps:$4 sm:$0xff]  }
  0x91   : > { %562 = vmatpush1.bf16.msra.mxu0 %v1582_v26  ;;  %v1648_v6 = vld [vmem:[#allocation8 + $0x200] ss:$8 sps:$4 sm:$0xff]   ;;  %v1653_v7 = vld [vmem:[#allocation8 + $0x214] ss:$8 sps:$4 sm:$0xff]   ;;  %v1651_v8 = vld [vmem:[#allocation8 + $0x210] ss:$8 sps:$4 sm:$0xff]  }
  0x92   : > { %654 = vmatpush1.bf16.msra.mxu1 %v1585_v27  ;;  %563 = vmatprep.subr.bf16.mxu0 %v1590_v28  ;;  %v1656_v9 = vld [vmem:[#allocation8 + $0x224] ss:$8 sps:$4 sm:$0xff]   ;;  %v1654_v10 = vld [vmem:[#allocation8 + $0x220] ss:$8 sps:$4 sm:$0xff]   ;;  %v1659_v11 = vld [vmem:[#allocation8 + $0x234] ss:$8 sps:$4 sm:$0xff]  }
  0x93   : > { %655 = vmatprep.subr.bf16.mxu1 %v1593_v29  ;;  %v1657_v12 = vld [vmem:[#allocation8 + $0x230] ss:$8 sps:$4 sm:$0xff]   ;;  %v1235_v13 = vld [vmem:[%s2148_s4] sm:$0xf]  ;;  %s1395_s23 = sshll.u32 %s2032_s2, 4  ;;  %s1485_s7 = sshll.u32 %s1888_s25, 8 }
  0x94   : > { %1238 = vperm.xlu0 %1551, %v1235_v13   ;;  %s318_s17 = scalar_lea.vmem [#allocation9], %s1395_s23  ;;  %s2100_s18 = scalar_lea.hbm %s2150_s6, %s1485_s7 }
  0x95   : > { %564 = vmatpush1.bf16.msra.mxu0 %v1588_v30  ;;  %s1280_s11 = sshll.u32 %s318_s17, 4  ;;  %s1266_s10 = scalar_lea.sflag [#allocation5], %s2032_s2  ;;  %s2102_s11 = int_to_ptr.vmem [resolvable:$true] %s1280_s11 }
  0x96   : > { %656 = vmatpush1.bf16.msra.mxu1 %v1591_v31  ;;  %565 = vmatprep.subr.bf16.mxu0 %v1596_v32  ;;  %s1749_s19 = scalar_lea.vmem %s2102_s11, 256  ;;  %p2171_p13 = scmp.ne.s32.totalorder %s2165_s14, 0 }
  0x97   : > { %657 = vmatprep.subr.bf16.mxu1 %v1599_v33  ;;  %p1750_p10 = scmp.ne.s32.totalorder %s2102_s11, %s1749_s19  ;;  %s1831_s25 = smov [#allocation9]  }
  0x98   : > { %s1753_s29 = sshll.u32 %s1831_s25, 4  ;;  %s1754_s29 = int_to_ptr.vmem [resolvable:$false] %s1753_s29 }
  0x99   : > { %566 = vmatpush1.bf16.msra.mxu0 %v1594_v34  ;;  %p1751_p3 = pnand %p1750_p10, %p2171_p13  ;;  %p1756_p9 = scmp.lt.s32.totalorder %s2102_s11, %s1754_s29 }
  0x9a   : > { %658 = vmatpush1.bf16.msra.mxu1 %v1597_v35  ;;  %743 = vmatprep.subr.bf16.mxu0 %v1602_v36 }
  0x9b   : > { %835 = vmatprep.subr.bf16.mxu1 %v1605_v37  ;;  %p1752_p7 = pneg %p1751_p3 }
  0x9c   : > { %1422 = vmatmul.mubr.msk.bf16.vlgmr.msra.gmra.mrb[4].mxu0 %vm371_vm0, %v2057_v21 }
  0x9d   : > { %1431 = vmatmul.mubr.msk.bf16.vlgmr.msra.gmra.mrb[4].mxu1 %vm371_vm0, %v2057_v21  ;;  %744 = vmatpush1.bf16.msra.mxu0 %v1600_v38 }
  0x9e   : > { %836 = vmatpush1.bf16.msra.mxu1 %v1603_v39  ;;  %745 = vmatprep.subr.bf16.mxu0 %v1608_v40 }
  0x9f   : > { %837 = vmatprep.subr.bf16.mxu1 %v1611_v41  ;;  %775 = vmatprep.mubr.bf16.mxu0 %v1830_v0 }
  0xa0   : > { %867 = vmatprep.mubr.bf16.mxu1 %v1830_v0 }
  0xa1   : > { %746 = vmatpush1.bf16.msra.mxu0 %v1606_v42 }
  0xa2   : > { %838 = vmatpush1.bf16.msra.mxu1 %v1609_v43  ;;  %747 = vmatprep.subr.bf16.mxu0 %v1614_v44 }
  0xa3   : > { %839 = vmatprep.subr.bf16.mxu1 %v1617_v45 }
  0xa5   : > { %748 = vmatpush1.bf16.msra.mxu0 %v1612_v46 }
  0xa6   : > { %840 = vmatpush1.bf16.msra.mxu1 %v1615_v47  ;;  %749 = vmatprep.subr.bf16.mxu0 %v1620_v48 }
  0xa7   : > { %841 = vmatprep.subr.bf16.mxu1 %v1623_v49 }
  0xa9   : > { %750 = vmatpush1.bf16.msra.mxu0 %v1618_v50 }
  0xaa   : > { %842 = vmatpush1.bf16.msra.mxu1 %v1621_v51  ;;  %927 = vmatprep.subr.bf16.mxu0 %v1626_v52 }
  0xab   : > { %1019 = vmatprep.subr.bf16.mxu1 %v1629_v53 }
  0xac   : > { %1440 = vmatmul.mubr.msk.bf16.vlgmr.msra.gmra.mrb[8].mxu0 %vm371_vm0, %v2057_v21 }
  0xad   : > { %1449 = vmatmul.mubr.msk.bf16.vlgmr.msra.gmra.mrb[8].mxu1 %vm371_vm0, %v2057_v21  ;;  %928 = vmatpush1.bf16.msra.mxu0 %v1624_v54 }
  0xae   : > { %1020 = vmatpush1.bf16.msra.mxu1 %v1627_v55  ;;  %929 = vmatprep.subr.bf16.mxu0 %v1632_v56 }
  0xaf   : > { %1021 = vmatprep.subr.bf16.mxu1 %v1635_v57  ;;  %959 = vmatprep.mubr.bf16.mxu0 %v1830_v0 }
  0xb0   : > { %1051 = vmatprep.mubr.bf16.mxu1 %v1830_v0 }
  0xb1   : > { %930 = vmatpush1.bf16.msra.mxu0 %v1630_v58 }
  0xb2   : > { %1022 = vmatpush1.bf16.msra.mxu1 %v1633_v59  ;;  %931 = vmatprep.subr.bf16.mxu0 %v1638_v60 }
  0xb3   : > { %1023 = vmatprep.subr.bf16.mxu1 %v1641_v61  ;;  %v1154_v61 = vld [vmem:[%s2147_s3] sm:$0x3] }
  0xb5   : > { %932 = vmatpush1.bf16.msra.mxu0 %v1636_v62  ;;  %v1251_v62 = vld [vmem:[%s2043_s30] sm:$0xff]  ;;  %s1755_s30 = scalar_lea.vmem %s1754_s29, 512 }
  0xb6   : > { %1024 = vmatpush1.bf16.msra.mxu1 %v1639_v63  ;;  %933 = vmatprep.subr.bf16.mxu0 %v1644_v1  ;;  %v1253_v63 = vcombine.high %v1251_v62, %v1251_v62  ;;  %1255 = vst [vmem:[%s318_s17] sm:$0xf] %v1251_v62  ;;  %p1757_p2 = scmp.lt.s32.totalorder %s1755_s30, %s1749_s19 }
  0xb7   : > { %1025 = vmatprep.subr.bf16.mxu1 %v1647_v2 }
  0xb8   : > { %1256 = vst [vmem:[%s318_s17 + $0x8] sm:$0xf] %v1253_v63  ;;  %p1758_p5 = por %p1757_p2, %p1756_p9 }
  0xb9   : > { %934 = vmatpush1.bf16.msra.mxu0 %v1642_v3 }
  0xba   : > { %1026 = vmatpush1.bf16.msra.mxu1 %v1645_v4  ;;  %1111 = vmatprep.subr.bf16.mxu0 %v1650_v5  ;;  %p1759_p1 = pnand %p1758_p5, %p1752_p7 }
  0xbc   : > { %1458 = vmatmul.mubr.msk.bf16.vlgmr.msra.gmra.mrb[12].mxu0 %vm371_vm0, %v2057_v21 }
  0xbd   : > { %1467 = vmatmul.mubr.msk.bf16.vlgmr.msra.gmra.mrb[12].mxu1 %vm371_vm0, %v2057_v21  ;;  %1112 = vmatpush1.bf16.msra.mxu0 %v1648_v6 }
  0xbe   : > { %1143 = vmatprep.mubr.bf16.mxu0 %v1830_v0  ;;  %1113 = vmatprep.subr.bf16.mxu0 %v1653_v7 }
  0xbf   : > { %1226 = vmatprep.mubr.bf16.mxu1 %v1830_v0  ;;  %v1243_v0 = vld [vmem:[%s2149_s5] sm:$0xf] }
  0xc0   : > { %1246 = vperm.xlu0 %1551, %v1243_v0  }
  0xc1   : > { %1114 = vmatpush1.bf16.msra.mxu0 %v1651_v8 }
  0xc2   : > { %1115 = vmatprep.subr.bf16.mxu0 %v1656_v9 }
  0xc5   : > { %1116 = vmatpush1.bf16.msra.mxu0 %v1654_v10 }
  0xc6   : > { %1117 = vmatprep.subr.bf16.mxu0 %v1659_v11 }
  0xc9   : > { %1118 = vmatpush1.bf16.msra.mxu0 %v1657_v12 }
  0xcc   : > { %1476 = vmatmul.mubr.msk.bf16.vlgmr.msra.gmra.mrb[16].mxu0 %vm371_vm0, %v2057_v21 }
 0x113   : > { %v1239_v1 = vpop.permute.xlu0 %1238 }
 0x13f   : > { %v1247_v5 = vpop.permute.xlu0 %1246 }
 0x15f   : > { %v409_v14 = vpop.f32.mrb[0].mxu0 }
 0x160   : > { %v501_v15 = vpop.f32.mrb[0].mxu1  ;;  %v411_v17 = vpop.f32.mrb[1].mxu0 }
 0x161   : > { %v1173_v16 = vpack.c.bf16 %v501_v15, %v409_v14  ;;  %v503_v18 = vpop.f32.mrb[1].mxu1  ;;  %v413_v20 = vpop.f32.mrb[2].mxu0 }
 0x162   : > { %v1174_v19 = vpack.c.bf16 %v503_v18, %v411_v17  ;;  %v505_v22 = vpop.f32.mrb[2].mxu1  ;;  %v414_v23 = vpop.f32.mrb[3].mxu0 }
 0x163   : > { %v506_v21 = vpop.f32.mrb[3].mxu1 }
 0x164   : > { %1194 = vmatprep.subr.bf16.mxu1 %v1174_v19 }
 0x165   : > { %1195 = vmatpush1.bf16.msra.mxu1 %v1173_v16 }
 0x16f   : > { %v593_v24 = vpop.f32.mrb[4].mxu0 }
 0x170   : > { %v685_v25 = vpop.f32.mrb[4].mxu1  ;;  %v595_v27 = vpop.f32.mrb[5].mxu0 }
 0x171   : > { %v1175_v26 = vpack.c.bf16 %v685_v25, %v593_v24  ;;  %v687_v28 = vpop.f32.mrb[5].mxu1  ;;  %v597_v30 = vpop.f32.mrb[6].mxu0 }
 0x172   : > { %v1176_v29 = vpack.c.bf16 %v687_v28, %v595_v27  ;;  %v689_v31 = vpop.f32.mrb[6].mxu1  ;;  %v598_v32 = vpop.f32.mrb[7].mxu0 }
 0x173   : > { %v690_v33 = vpop.f32.mrb[7].mxu1 }
 0x174   : > { %1196 = vmatprep.subr.bf16.mxu1 %v1176_v29 }
 0x175   : > { %1197 = vmatpush1.bf16.msra.mxu1 %v1175_v26 }
 0x17f   : > { %v777_v34 = vpop.f32.mrb[8].mxu0 }
 0x180   : > { %v869_v35 = vpop.f32.mrb[8].mxu1  ;;  %v779_v37 = vpop.f32.mrb[9].mxu0 }
 0x181   : > { %v1177_v36 = vpack.c.bf16 %v869_v35, %v777_v34  ;;  %v871_v38 = vpop.f32.mrb[9].mxu1  ;;  %v781_v40 = vpop.f32.mrb[10].mxu0 }
 0x182   : > { %v1178_v39 = vpack.c.bf16 %v871_v38, %v779_v37  ;;  %v873_v41 = vpop.f32.mrb[10].mxu1  ;;  %v782_v42 = vpop.f32.mrb[11].mxu0 }
 0x183   : > { %v874_v43 = vpop.f32.mrb[11].mxu1 }
 0x184   : > { %1198 = vmatprep.subr.bf16.mxu1 %v1178_v39 }
 0x185   : > { %1199 = vmatpush1.bf16.msra.mxu1 %v1177_v36 }
 0x18f   : > { %v961_v44 = vpop.f32.mrb[12].mxu0 }
 0x190   : > { %v1053_v45 = vpop.f32.mrb[12].mxu1  ;;  %v963_v47 = vpop.f32.mrb[13].mxu0 }
 0x191   : > { %v1179_v46 = vpack.c.bf16 %v1053_v45, %v961_v44  ;;  %v1055_v48 = vpop.f32.mrb[13].mxu1  ;;  %v965_v50 = vpop.f32.mrb[14].mxu0 }
 0x192   : > { %v1180_v49 = vpack.c.bf16 %v1055_v48, %v963_v47  ;;  %v1057_v51 = vpop.f32.mrb[14].mxu1  ;;  %v966_v52 = vpop.f32.mrb[15].mxu0 }
 0x193   : > { %v1058_v53 = vpop.f32.mrb[15].mxu1 }
 0x194   : > { %1200 = vmatprep.subr.bf16.mxu1 %v1180_v49 }
 0x195   : > { %1201 = vmatpush1.bf16.msra.mxu1 %v1179_v46 }
 0x19f   : > { %v1145_v54 = vpop.f32.mrb[16].mxu0 }
 0x1a0   : > { %v1181_v55 = vpack.c.bf16 %v1145_v54, %v1145_v54  ;;  %v1147_v56 = vpop.f32.mrb[17].mxu0 }
 0x1a1   : > { %v1182_v57 = vpack.c.bf16 %v1147_v56, %v1147_v56  ;;  %v1149_v58 = vpop.f32.mrb[18].mxu0 }
 0x1a2   : > { %v1189_v59 = vsel %vm1187_vm1, %v1181_v55, 0  ;;  %v1150_v60 = vpop.f32.mrb[19].mxu0 }
 0x1a3   : > { %1477 = vmatprep.subr.msk.bf16.mxu1 %vm1187_vm1, %v1182_v57 }
 0x1a4   : > { %1203 = vmatpush1.bf16.msra.mxu1 %v1189_v59 }
 0x1a7   : > { %1478 = vmatmul.mubr.msk.bf16.vlgmr.msra.gmra.mrb[16].mxu1 %vm1183_vm2, %v1154_v61 }
 0x27a   : > { %v1228_v2 = vpop.f32.mrb[16].mxu1 }
 0x27b   : > { %v1241_v3 = vmul.f32 %v1239_v1, %v1228_v2  ;;  %v1230_v4 = vpop.f32.mrb[17].mxu1 }
 0x27c   : > { %v1242_v6 = vmul.f32 %v1239_v1, %v1230_v4  ;;  %v1232_v7 = vpop.f32.mrb[18].mxu1 }
 0x27d   : > { %v1249_v8 = vadd.f32 %v1247_v5, %v1241_v3  ;;  %v1233_v9 = vpop.f32.mrb[19].mxu1 }
 0x27e   : > { %v1250_v10 = vadd.f32 %v1247_v5, %v1242_v6 }
 0x27f   : > { %v1259_v11 = vrot.slane %v1249_v8, 4 }
 0x280   : > { %v1260_v12 = vrot.slane %v1250_v10, 4 }
 0x281   : > { %1263 = vst [vmem:[%s318_s17] sm:$0xf0] %v1259_v11 }
 0x282   : > { %1264 = vst [vmem:[%s318_s17 + $0x8] sm:$0xf0] %v1260_v12 }
 0x283   : > { %1762 = shalt.err (!%p1759_p1)
}
 0x284   : > { %s1763_s2 = scalar_lea.hbm %s2100_s18, 256  ;;  %s1767_s8 = scalar_lea.hbm %s2150_s6, 512 }
 0x285   : > { %p1764_p6 = scmp.ne.s32.totalorder %s2100_s18, %s1763_s2  ;;  %p1768_p12 = scmp.lt.u32.totalorder %s2100_s18, %s2150_s6 }
 0x286   : > { %p1769_p11 = scmp.lt.u32.totalorder %s1767_s8, %s1763_s2  ;;  %p1771_p10 = scmp.lt.u32.totalorder %s1763_s2, %s2100_s18 }
 0x287   : > { %p1765_p8 = pnand %p1764_p6, %p2171_p13 }
 0x288   : > { %p1770_p0 = por %p1769_p11, %p1768_p12 }
 0x289   : > { %p1766_p4 = pneg %p1765_p8 }
 0x28a   : > { %p1772_p3 = por %p1771_p10, %p1770_p0 }
 0x28c   : > { %p1773_p7 = pnand %p1772_p3, %p1766_p4 }
 0x28e   : > { %1776 = shalt.err (!%p1773_p7)
}
 0x28f   : > { %1494 = dma.vmem_to_hbm [thread:$0]  (%p2171_p13), %s2102_s11, 256, %s2100_s18, %s1266_s10  }
 0x290 PF: > { %s1292_s20 = sand.u32 1, %s1811_s21   ;;  %p2172_p9 = scmp.ne.s32.totalorder %s2159_s28, 0 }
 0x291   : > { %p2173_p2 = scmp.ge.s32.totalorder %s1823_s24, 2  ;;  %s1293_s23 = scalar_lea.sflag [#allocation5], %s1292_s20 }
 0x293   : > { %p1508_p5 = pnand %p2173_p2, %p2172_p9 }
 0x295   : > { %1806 = dma.done.wait (!%p1508_p5), %s1293_s23, 256  }
 0x296   : > { %1808 = vsyncadd (!%p1508_p5), %s1293_s23, 4294967040  ;;  %s2174_s17 = sld [smem:[#allocation14_spill]]  ;;  %s2175_s23 = sld [smem:[#allocation15_spill]] }
 0x297   : > { %p22_p1 = scmp.ge.s32.totalorder %s1923_s9, 4   ;;  %s2176_s21 = smov %s1815_s22 }
 0x298   : > { %s2178_s24 = smov %s1923_s9 }
 0x299   :  { %24 = sbr.rel (!%p22_p1) target bundleno = 9 (0x9), region = 114 }
 0x29c   : > { %s2177_s22 = smov %s2174_s17 }
 0x2a0   :  { %1298 = vsyncpa [#allocation4], 1 }
 0x2a1   :  { %1300 = vsyncpa [#allocation4 + $0x1], 1 }
 0x2a2   :  { %1301 = vsyncpa [#allocation7], 1 }
 0x2a3   :  { %1303 = vsyncpa [#allocation7 + $0x1], 1 }
 0x2a4   :  { %1304 = vsyncpa [#allocation5], 1 }
 0x2a5   :  { %1306 = vsyncpa [#allocation5 + $0x1], 1 }

</bundles_post_ra>
